<compile_context>
chip_gen: v6e
topology: v6e:2x2x1
jax: 0.10.0
libtpu: 0.0.40
codegen_flags: <defaults>
</compile_context>

<pallas_src>
import jax
import jax.numpy as jnp
from jax.experimental import pallas as pl
from jax.experimental.pallas import tpu as pltpu


def _round_up(x, m):
    return (x + m - 1) // m * m


def _fused_head_kernel(x_ref, w_ref, b_ref, o_ref):
    """One fused matmul: (tile_n, C) @ (C, out_p) + (1, out_p)."""
    acc = jnp.dot(x_ref[...], w_ref[...], preferred_element_type=jnp.float32)
    o_ref[...] = (acc + b_ref[...]).astype(o_ref.dtype)


def fast_rcnn_predictor(x, w_cls, b_cls, w_bbox, b_bbox):
    """Pallas-backed forward of FastRCNNPredictor.

    Args:
      x:      (N, C) or (N, C, 1, 1) float32
      w_cls:  (num_classes, C)        float32  (PyTorch Linear layout)
      b_cls:  (num_classes,)          float32
      w_bbox: (4*num_classes, C)      float32
      b_bbox: (4*num_classes,)        float32
    Returns:
      (scores (N, num_classes), bbox_deltas (N, 4*num_classes))
    """
    if x.ndim == 4:
        assert x.shape[2] == 1 and x.shape[3] == 1, "spatial dims must be [1, 1]"
    out_dtype = x.dtype
    x2 = x.reshape(x.shape[0], -1)                     # flatten(start_dim=1)
    n, c = x2.shape
    nc = w_cls.shape[0]
    nb = w_bbox.shape[0]
    n_out = nc + nb

    # ---- wrapper-side layout plumbing (plain JAX glue) -------------------
    # Fuse both heads into a single (C, nc+nb) weight, pad the output lane
    # dim to a multiple of 128, and cast operands to bf16.
    w_fused = jnp.concatenate([w_cls.T, w_bbox.T], axis=1)      # (C, nc+nb)
    b_fused = jnp.concatenate([b_cls, b_bbox], axis=0)          # (nc+nb,)

    out_p = _round_up(n_out, 128)
    w_p = jnp.pad(w_fused, ((0, 0), (0, out_p - n_out))).astype(jnp.bfloat16)
    b_p = jnp.pad(b_fused, (0, out_p - n_out)).reshape(1, out_p).astype(jnp.float32)

    # Tile the N axis; weights/bias stay resident across grid steps.
    if n >= 512:
        tile_n = 512                                   # fits v5e/v6e/v7x VMEM
    else:
        tile_n = max(_round_up(n, 16), 16)             # bf16 sublane multiple
    n_p = _round_up(n, tile_n)
    x_p = jnp.pad(x2, ((0, n_p - n), (0, 0))).astype(jnp.bfloat16)

    grid = (n_p // tile_n,)

    cost = pl.CostEstimate(
        flops=2 * n_p * c * out_p,
        transcendentals=0,
        bytes_accessed=(x_p.size * 2 + w_p.size * 2 + b_p.size * 4
                        + n_p * out_p * jnp.dtype(out_dtype).itemsize),
    )

    fused = pl.pallas_call(
        _fused_head_kernel,
        out_shape=jax.ShapeDtypeStruct((n_p, out_p), out_dtype),
        grid=grid,
        in_specs=[
            pl.BlockSpec((tile_n, c), lambda i: (i, 0)),   # x tile (pipelined)
            pl.BlockSpec((c, out_p), lambda i: (0, 0)),    # fused W (resident)
            pl.BlockSpec((1, out_p), lambda i: (0, 0)),    # fused bias (resident)
        ],
        out_specs=pl.BlockSpec((tile_n, out_p), lambda i: (i, 0)),
        compiler_params=pltpu.CompilerParams(
            dimension_semantics=("parallel",)),
        cost_estimate=cost,
    )(x_p, w_p, b_p)

    scores = fused[:n, :nc]
    bbox_deltas = fused[:n, nc:n_out]
    return scores, bbox_deltas


def init_params(key, in_channels, num_classes):
    """Deterministic synthetic init matching nn.Linear parameter shapes."""
    k1, k2, k3, k4 = jax.random.split(key, 4)
    bound_c = 1.0 / jnp.sqrt(in_channels)
    w_cls = jax.random.uniform(k1, (num_classes, in_channels),
                               jnp.float32, -bound_c, bound_c)
    b_cls = jax.random.uniform(k2, (num_classes,),
                               jnp.float32, -bound_c, bound_c)
    w_bbox = jax.random.uniform(k3, (num_classes * 4, in_channels),
                                jnp.float32, -bound_c, bound_c)
    b_bbox = jax.random.uniform(k4, (num_classes * 4,),
                                jnp.float32, -bound_c, bound_c)
    return w_cls, b_cls, w_bbox, b_bbox


if __name__ == "__main__":
    key = jax.random.PRNGKey(0)
    kx, kp = jax.random.split(key)

    batch = 2
    in_channels = 32
    num_classes = 5

    # 4-D input with [1, 1] spatial, as produced by the RoI head's box_head.
    x = jax.random.normal(kx, (batch, in_channels, 1, 1), jnp.float32)
    w_cls, b_cls, w_bbox, b_bbox = init_params(kp, in_channels, num_classes)

    scores, bbox_deltas = fast_rcnn_predictor(x, w_cls, b_cls, w_bbox, b_bbox)
    jax.block_until_ready((scores, bbox_deltas))

    # Reference check in plain JAX (same math as the PyTorch module).
    # Tolerance is loosened because the kernel uses bf16 inputs with f32
    # accumulation.
    x2 = x.reshape(batch, -1)
    ref_scores = x2 @ w_cls.T + b_cls
    ref_bbox = x2 @ w_bbox.T + b_bbox
    assert scores.shape == (batch, num_classes)
    assert bbox_deltas.shape == (batch, num_classes * 4)
    assert jnp.allclose(scores, ref_scores, atol=2e-2, rtol=2e-2)
    assert jnp.allclose(bbox_deltas, ref_bbox, atol=2e-2, rtol=2e-2)

    print("KERNEL_OK")
</pallas_src>

<mosaic_0001>
module attributes {stable_mosaic.version = 11 : i64} {
  func.func @_fused_head_kernel(%arg0: i32, %arg1: memref<16x32xbf16, #tpu.memory_space<vmem>>, %arg2: memref<32x128xbf16, #tpu.memory_space<vmem>>, %arg3: memref<1x128xf32, #tpu.memory_space<vmem>>, %arg4: memref<16x128xf32, #tpu.memory_space<vmem>>) attributes {dimension_semantics = [#tpu.dimension_semantics<parallel>], iteration_bounds = array<i64: 1>, scalar_prefetch = 0 : i64, scratch_operands = 0 : i64, tpu.core_type = #tpu.core_type<tc>, window_params = [{transform_indices = @transform_0, window_bounds = array<i64: 16, 32>}, {pipeline_mode = #tpu.pipeline_mode<synchronous>, transform_indices = @transform_1, window_bounds = array<i64: 32, 128>}, {pipeline_mode = #tpu.pipeline_mode<synchronous>, transform_indices = @transform_2, window_bounds = array<i64: 1, 128>}, {transform_indices = @transform_3, window_bounds = array<i64: 16, 128>}]} {
    %c0 = arith.constant 0 : index
    %c0_0 = arith.constant 0 : index
    %0 = vector.load %arg1[%c0, %c0_0] : memref<16x32xbf16, #tpu.memory_space<vmem>>, vector<16x32xbf16>
    %c0_1 = arith.constant 0 : index
    %c0_2 = arith.constant 0 : index
    %1 = vector.load %arg2[%c0_1, %c0_2] : memref<32x128xbf16, #tpu.memory_space<vmem>>, vector<32x128xbf16>
    %cst = arith.constant dense<0.000000e+00> : vector<16x128xf32>
    %2 = tpu.matmul %0, %1, %cst {dimension_numbers = #tpu.dot_dimension_numbers<[1], [0], [0], [1], [0, 0, 1, 1], [], []>} : vector<16x32xbf16>, vector<32x128xbf16>, vector<16x128xf32> -> vector<16x128xf32>
    %c0_3 = arith.constant 0 : index
    %c0_4 = arith.constant 0 : index
    %3 = vector.load %arg3[%c0_3, %c0_4] : memref<1x128xf32, #tpu.memory_space<vmem>>, vector<1x128xf32>
    %4 = vector.broadcast %3 : vector<1x128xf32> to vector<16x128xf32>
    %5 = arith.addf %2, %4 : vector<16x128xf32>
    %c0_5 = arith.constant 0 : index
    %c0_6 = arith.constant 0 : index
    %6 = vector.load %arg4[%c0_5, %c0_6] : memref<16x128xf32, #tpu.memory_space<vmem>>, vector<16x128xf32>
    tpu.vector_store %arg4[%c0_5, %c0_6], %5 {strides = array<i32>} : memref<16x128xf32, #tpu.memory_space<vmem>>, vector<16x128xf32>,
    return
  }
  func.func @transform_0(%arg0: i32) -> (i32, i32) {
    %c0_i32 = arith.constant 0 : i32
    %c0_i32_0 = arith.constant 0 : i32
    return %arg0, %c0_i32 : i32, i32
  }
  func.func @transform_1(%arg0: i32) -> (i32, i32) {
    %c0_i32 = arith.constant 0 : i32
    %c0_i32_0 = arith.constant 0 : i32
    %c0_i32_1 = arith.constant 0 : i32
    return %c0_i32, %c0_i32_0 : i32, i32
  }
  func.func @transform_2(%arg0: i32) -> (i32, i32) {
    %c0_i32 = arith.constant 0 : i32
    %c0_i32_0 = arith.constant 0 : i32
    %c0_i32_1 = arith.constant 0 : i32
    return %c0_i32, %c0_i32_0 : i32, i32
  }
  func.func @transform_3(%arg0: i32) -> (i32, i32) {
    %c0_i32 = arith.constant 0 : i32
    %c0_i32_0 = arith.constant 0 : i32
    return %arg0, %c0_i32 : i32, i32
  }
}

</mosaic_0001>

<bundles_post_ra>
// kernel: tpu_custom_call.1
= control target key start
LH: loop header
LB: loop body
LE: loop exit
PB: predicated region body
PF: predicated region fallthrough
CT: control target
= control target key end

     0   :  { %8 = vsyncpa [#allocation3], 0  ;;  %s274_s0 = inlined_call_operand.hbm [shape: bf16[16,32], index: 0, kind: input, shape index: {}]   ;;  %s275_s1 = inlined_call_operand.hbm [shape: bf16[32,128], index: 1, kind: input, shape index: {}]   ;;  %s276_s2 = inlined_call_operand.vmem [shape: f32[1,128], index: 2, kind: input, shape index: {}]   ;;  %s277_s3 = inlined_call_operand.hbm [shape: f32[16,128], index: 3, kind: output, shape index: {}]  }
   0x1   :  { %9 = vsyncpa [#allocation6], 0 }
   0x2   :  { %10 = vsyncpa [#allocation4], 0  ;;  %s233_s12 = smov [#allocation2]  }
   0x3   :  { %s16_s13 = sshll.u32 %s233_s12, 4  ;;  %s17_s13 = int_to_ptr.vmem [resolvable:$true] %s16_s13 }
   0x4   :  { %s175_s14 = scalar_lea.vmem %s17_s13, 128  ;;  %p180_p1 = scmp.lt.s32.totalorder %s17_s13, %s17_s13 }
   0x5   :  { %p176_p0 = scmp.ne.s32.totalorder %s17_s13, %s175_s14  ;;  %p181_p2 = scmp.lt.s32.totalorder %s175_s14, %s175_s14 }
   0x7   :  { %p182_p3 = por %p181_p2, %p180_p1 }
   0x9   :  { %p183_p4 = pnand %p182_p3, %p176_p0 }
   0xb   :  { %186 = shalt.err (!%p183_p4)
}
   0xc   :  { %s234_s15 = smov 64   ;;  %s235_s16 = smov 4  }
   0xd   :  { %22 = dma.hbm_to_vmem [thread:$0]  %s274_s0, 128, %s17_s13, [#allocation3], %s234_s15, %s234_s15, %s235_s16  }
   0xe   :  { %s236_s19 = smov [#allocation5]  }
   0xf   :  { %s28_s20 = sshll.u32 %s236_s19, 4  ;;  %s29_s20 = int_to_ptr.vmem [resolvable:$true] %s28_s20 }
  0x10   :  { %s195_s21 = scalar_lea.vmem %s29_s20, 256  ;;  %p200_p6 = scmp.lt.s32.totalorder %s29_s20, %s29_s20 }
  0x11   :  { %p196_p5 = scmp.ne.s32.totalorder %s29_s20, %s195_s21  ;;  %p201_p7 = scmp.lt.s32.totalorder %s195_s21, %s195_s21 }
  0x13   :  { %p202_p8 = por %p201_p7, %p200_p6 }
  0x15   :  { %p203_p9 = pnand %p202_p8, %p196_p5 }
  0x17   :  { %206 = shalt.err (!%p203_p9)
}
  0x18   :  { %34 = dma.hbm_to_vmem [thread:$0]  %s275_s1, 256, %s29_s20, [#allocation6], %s234_s15, %s234_s15, %s235_s16  }
  0x19   :  { %227 = dma.done.wait [#allocation3], 128  }
  0x1a   :  { %228 = vsyncadd [#allocation3], 4294967168 }
  0x1b   :  { %229 = dma.done.wait [#allocation6], 256  }
  0x1c   :  { %230 = vsyncadd [#allocation6], 4294967040  ;;  %v237_v0 = vmov 0.0   ;;  %vm238_vm0 = vmmov 0   ;;  %v164_v1 = vld [vmem:[#allocation5 + $0x8] sm:$0xff]   ;;  %v165_v2 = vld [vmem:[#allocation5] sm:$0xff]  }
  0x1d   :  { %147 = vmatprep.subr.bf16.mxu0 %v237_v0  ;;  %151 = vmatprep.mubr.msk.bf16.mxu0 %vm238_vm0, %v237_v0  ;;  %v166_v3 = vld [vmem:[#allocation2] sm:$0xff]   ;;  %vm74_vm1 = vcmask 261120   ;;  %s239_s1 = smov [#allocation7]  }
  0x1e   :  { %148 = vmatpush3.bf16.msra.mxu0 %v164_v1  ;;  %v139_v4 = vld [vmem:[%s276_s2] ss:$0 sm:$0xff]  ;;  %s126_s25 = sshll.u32 %s239_s1, 4  ;;  %s127_s25 = int_to_ptr.vmem [resolvable:$true] %s126_s25 }
  0x1f   :  { %149 = vmatprep.subr.bf16.mxu0 %v237_v0  ;;  %s207_s26 = scalar_lea.vmem %s127_s25, 256  ;;  %p212_p11 = scmp.lt.s32.totalorder %s127_s25, %s127_s25 }
  0x20   :  { %p208_p10 = scmp.ne.s32.totalorder %s127_s25, %s207_s26  ;;  %p213_p12 = scmp.lt.s32.totalorder %s207_s26, %s207_s26 }
  0x22   :  { %150 = vmatpush3.bf16.msra.mxu0 %v165_v2  ;;  %p214_p13 = por %p213_p12, %p212_p11 }
  0x24   :  { %p215_p0 = pnand %p214_p13, %p208_p10 }
  0x25   :  { %152 = vmatmul.mubr.msk.bf16.vlgmr.msra.gmra.mxu0 %vm74_vm1, %v166_v3 }
  0xe5   :  { %v112_v5 = vpop.f32.mrf.mxu0 }
  0xe6   :  { %v113_v6 = vadd.f32 %v139_v4, %v112_v5 }
  0xe7   :  { %v153_v7 = vpop.f32.mrf.mxu0 }
  0xe8   :  { %119 = vst [vmem:[#allocation7] sm:$0xff] %v113_v6 }
  0xe9   :  { %v115_v8 = vpop.f32.mrf.mxu0 }
  0xea   :  { %v116_v9 = vadd.f32 %v139_v4, %v115_v8 }
  0xeb   :  { %v154_v10 = vpop.f32.mrf.mxu0 }
  0xec   :  { %120 = vst [vmem:[#allocation7 + $0x8] sm:$0xff] %v116_v9 }
  0xed   :  { %218 = shalt.err (!%p215_p0)
}
  0xee   :  { %s240_s27 = smov 128   ;;  %s241_s2 = smov 8  }
  0xef   :  { %132 = dma.vmem_to_hbm [thread:$0]  %s127_s25, 256, %s277_s3, [#allocation4], %s240_s27, %s240_s27, %s241_s2  }
  0xf0   :  { %231 = dma.done.wait [#allocation4], 256  }
  0xf1   :  { %232 = vsyncadd [#allocation4], 4294967040 }
  0xf2   :  { %136 = vsyncpa [#allocation3], 1 }
  0xf3   :  { %137 = vsyncpa [#allocation6], 1 }
  0xf4   :  { %138 = vsyncpa [#allocation4], 1 }

</bundles_post_ra>
